<compile_context>
chip_gen: v7x
topology: tpu7x:2x2x1
jax: 0.10.0
libtpu: 0.0.40
codegen_flags: <defaults>
</compile_context>

<pallas_src>
import functools

import jax
import jax.numpy as jnp
from jax.experimental import pallas as pl
from jax.experimental.pallas import tpu as pltpu


def _round_up(x, m):
    return (x + m - 1) // m * m


def _cdiv(a, b):
    return (a + b - 1) // b


def _mlp_kernel(x_ref, w1_ref, b1_ref, w2_ref, b2_ref, wp_ref, bp_ref,
                out_ref, *, out_size, apply_softmax):
    # Activations arrive already in the MXU operand dtype (e.g. bf16); matmuls
    # accumulate in f32, bias add / ReLU / softmax stay in f32.
    cdt = w1_ref.dtype

    # hidden layer 1: Linear + ReLU
    h = jnp.dot(x_ref[...], w1_ref[...], preferred_element_type=jnp.float32)
    h = jnp.maximum(h + b1_ref[...], 0.0)

    # hidden layer 2: Linear + ReLU
    h = jnp.dot(h.astype(cdt), w2_ref[...], preferred_element_type=jnp.float32)
    h = jnp.maximum(h + b2_ref[...], 0.0)

    # predict head
    logits = jnp.dot(h.astype(cdt), wp_ref[...],
                     preferred_element_type=jnp.float32)
    logits = logits + bp_ref[...]

    if apply_softmax:
        # Output width is zero-padded to a lane-dense multiple of 128; mask the
        # padded lanes so they contribute nothing to the normalization.
        col = jax.lax.broadcasted_iota(jnp.int32, logits.shape, 1)
        logits = jnp.where(col < out_size, logits, -1e30)
        m = jnp.max(logits, axis=-1, keepdims=True)
        e = jnp.exp(logits - m)
        denom = jnp.sum(e, axis=-1, keepdims=True)
        # Exact divide: denom is only (tile_b, 1), and exact normalization keeps
        # probability rows summing to 1 for Categorical sampling downstream.
        out_ref[...] = (e / denom).astype(out_ref.dtype)
    else:
        out_ref[...] = logits.astype(out_ref.dtype)


def _choose_tile_b(batch, max_tile_b, sublane, min_grid_steps=2):
    """Balanced batch tiling.

    Keeps per-tile zero padding below one sublane group and guarantees at
    least `min_grid_steps` grid steps (so v7x's two TensorCores both get work
    through the "parallel" dimension semantics, and the pipeline has room to
    overlap DMA with compute) whenever the batch is big enough.
    """
    num_tiles = max(1, _cdiv(batch, max_tile_b))
    if batch >= sublane * min_grid_steps:
        num_tiles = max(num_tiles, min_grid_steps)
        # Even step counts split cleanly across two TensorCores.
        if num_tiles % 2 and batch >= sublane * (num_tiles + 1):
            num_tiles += 1
    tile_b = _round_up(_cdiv(batch, num_tiles), sublane)
    b_pad = _round_up(batch, tile_b)
    return tile_b, b_pad


def mlp_forward(x_nchw, params, *, is_policy=True, weight_dtype=jnp.bfloat16,
                out_dtype=jnp.float32, max_tile_b=1024):
    """Runs the fused MLP Pallas kernel.

    x_nchw: (B, C, H, W) input (any float dtype); flattened like torch
            x.reshape(B, -1).
    params: dict with w1 (F,H1), b1 (1,H1), w2 (H1,H2), b2 (1,H2),
            wp (H2,O), bp (1,O)  (weights stored as (in, out): y = x @ W + b).
    Returns (B, O) out_dtype: softmax probs if is_policy else logits.
    """
    B = x_nchw.shape[0]
    x2d = x_nchw.reshape(B, -1)
    F = x2d.shape[1]
    h1, h2 = params["w1"].shape[1], params["w2"].shape[1]
    out_size = params["wp"].shape[1]

    # Lane-dense padded feature widths (exact math: zero padding).
    f_pad = _round_up(F, 128)
    h1_pad = _round_up(h1, 128)
    h2_pad = _round_up(h2, 128)
    o_pad = _round_up(out_size, 128)

    # Activations stream in the weight dtype (bf16 halves the dominant
    # HBM->VMEM DMA volume; the MXU only consumes bf16 operands anyway).
    xbytes = jnp.dtype(weight_dtype).itemsize
    sublane = 16 if xbytes < 4 else 8           # packed-sublane friendly tiles
    tile_b, b_pad = _choose_tile_b(B, max_tile_b, sublane)

    xp = x2d.astype(weight_dtype)
    if b_pad != B or f_pad != F:
        # Only pad what is actually missing: with F already a multiple of 128
        # (1024 here) this touches just the batch remainder.
        xp = jnp.pad(xp, ((0, b_pad - B), (0, f_pad - F)))

    w1 = jnp.pad(params["w1"], ((0, f_pad - F), (0, h1_pad - h1))).astype(weight_dtype)
    w2 = jnp.pad(params["w2"], ((0, h1_pad - h1), (0, h2_pad - h2))).astype(weight_dtype)
    wp = jnp.pad(params["wp"], ((0, h2_pad - h2), (0, o_pad - out_size))).astype(weight_dtype)
    b1 = jnp.pad(params["b1"], ((0, 0), (0, h1_pad - h1))).astype(jnp.float32)
    b2 = jnp.pad(params["b2"], ((0, 0), (0, h2_pad - h2))).astype(jnp.float32)
    bp = jnp.pad(params["bp"], ((0, 0), (0, o_pad - out_size))).astype(jnp.float32)

    grid = (b_pad // tile_b,)

    # Activation/output streams are tiled over the batch; weights/biases return
    # the same block index every step so they stay VMEM-resident (no re-DMA).
    x_spec = pl.BlockSpec((tile_b, f_pad), lambda i: (i, 0))
    w1_spec = pl.BlockSpec((f_pad, h1_pad), lambda i: (0, 0))
    b1_spec = pl.BlockSpec((1, h1_pad), lambda i: (0, 0))
    w2_spec = pl.BlockSpec((h1_pad, h2_pad), lambda i: (0, 0))
    b2_spec = pl.BlockSpec((1, h2_pad), lambda i: (0, 0))
    wp_spec = pl.BlockSpec((h2_pad, o_pad), lambda i: (0, 0))
    bp_spec = pl.BlockSpec((1, o_pad), lambda i: (0, 0))
    out_spec = pl.BlockSpec((tile_b, o_pad), lambda i: (i, 0))

    # Explicit VMEM budget: double-buffered bf16 x / out tiles + resident
    # weights (conservatively counted double-buffered).  Capped at 48 MiB so a
    # tile that fits v5e/v6e (128 MiB VMEM) never OOMs v7x (64 MiB physical).
    obytes = jnp.dtype(out_dtype).itemsize
    est = (2 * tile_b * f_pad * xbytes
           + 2 * tile_b * o_pad * obytes
           + 2 * (f_pad * h1_pad + h1_pad * h2_pad + h2_pad * o_pad) * xbytes
           + 2 * (h1_pad + h2_pad + o_pad) * 4)
    vmem_limit = int(min(48 * 1024 * 1024,
                         max(8 * 1024 * 1024, est + (est >> 1))))

    kernel = functools.partial(_mlp_kernel, out_size=out_size,
                               apply_softmax=is_policy)

    out = pl.pallas_call(
        kernel,
        out_shape=jax.ShapeDtypeStruct((b_pad, o_pad), out_dtype),
        grid=grid,
        in_specs=[x_spec, w1_spec, b1_spec, w2_spec, b2_spec, wp_spec, bp_spec],
        out_specs=out_spec,
        compiler_params=pltpu.CompilerParams(
            dimension_semantics=("parallel",),
            vmem_limit_bytes=vmem_limit,
        ),
    )(xp, w1, b1, w2, b2, wp, bp)

    return out[:B, :out_size]


def _xavier_uniform(key, fan_in, fan_out, dtype=jnp.float32):
    limit = (6.0 / (fan_in + fan_out)) ** 0.5
    return jax.random.uniform(key, (fan_in, fan_out), dtype,
                              minval=-limit, maxval=limit)


def init_mlp_params(key, in_size, layer_sizes, out_size):
    """Deterministic parameter init (xavier uniform weights, zero biases),
    matching BaseModule.reset() semantics. Weights stored as (in, out)."""
    sizes = [in_size] + list(layer_sizes)
    k1, k2, k3 = jax.random.split(key, 3)
    return {
        "w1": _xavier_uniform(k1, sizes[0], sizes[1]),
        "b1": jnp.zeros((1, sizes[1]), jnp.float32),
        "w2": _xavier_uniform(k2, sizes[1], sizes[2]),
        "b2": jnp.zeros((1, sizes[2]), jnp.float32),
        "wp": _xavier_uniform(k3, sizes[2], out_size),
        "bp": jnp.zeros((1, out_size), jnp.float32),
    }


if __name__ == "__main__":
    key = jax.random.PRNGKey(0)
    k_x, k_p = jax.random.split(key)

    # Small shapes consistent with the module: observation (B, C, H, W),
    # reshape=True flattens it to in_size = C*H*W.
    B, C, H, W = 2, 4, 16, 16
    in_size = C * H * W
    layer_sizes = [64, 64]
    out_size = 8  # discrete action dim for the policy head

    x = jax.random.normal(k_x, (B, C, H, W), dtype=jnp.float32)
    params = init_mlp_params(k_p, in_size, layer_sizes, out_size)

    wdt = jnp.bfloat16
    probs = mlp_forward(x, params, is_policy=True, weight_dtype=wdt)
    jax.block_until_ready(probs)

    # Reference in plain JAX using the same bf16-operand / f32-accumulate path.
    x2d = x.reshape(B, -1).astype(wdt)
    w1 = params["w1"].astype(wdt)
    w2 = params["w2"].astype(wdt)
    wp = params["wp"].astype(wdt)
    h = jnp.dot(x2d, w1, preferred_element_type=jnp.float32)
    h = jnp.maximum(h + params["b1"], 0.0)
    h = jnp.dot(h.astype(wdt), w2, preferred_element_type=jnp.float32)
    h = jnp.maximum(h + params["b2"], 0.0)
    logits = jnp.dot(h.astype(wdt), wp, preferred_element_type=jnp.float32)
    logits = logits + params["bp"]
    ref = jax.nn.softmax(logits, axis=-1)

    assert probs.shape == (B, out_size)
    # bf16 operands + MXU accumulation order => modest tolerance.
    assert jnp.allclose(probs, ref, atol=2e-3, rtol=2e-3)
    assert jnp.allclose(jnp.sum(probs, axis=-1), 1.0, atol=1e-5)

    print("KERNEL_OK")
</pallas_src>

<mosaic_0001>
module attributes {stable_mosaic.version = 11 : i64} {
  func.func @_mlp_kernel(%arg0: i32, %arg1: memref<16x1024xbf16, #tpu.memory_space<vmem>>, %arg2: memref<1024x128xbf16, #tpu.memory_space<vmem>>, %arg3: memref<1x128xf32, #tpu.memory_space<vmem>>, %arg4: memref<128x128xbf16, #tpu.memory_space<vmem>>, %arg5: memref<1x128xf32, #tpu.memory_space<vmem>>, %arg6: memref<128x128xbf16, #tpu.memory_space<vmem>>, %arg7: memref<1x128xf32, #tpu.memory_space<vmem>>, %arg8: memref<16x128xf32, #tpu.memory_space<vmem>>) attributes {dimension_semantics = [#tpu.dimension_semantics<parallel>], iteration_bounds = array<i64: 1>, scalar_prefetch = 0 : i64, scratch_operands = 0 : i64, tpu.core_type = #tpu.core_type<tc>, window_params = [{transform_indices = @transform_0, window_bounds = array<i64: 16, 1024>}, {pipeline_mode = #tpu.pipeline_mode<synchronous>, transform_indices = @transform_1, window_bounds = array<i64: 1024, 128>}, {pipeline_mode = #tpu.pipeline_mode<synchronous>, transform_indices = @transform_2, window_bounds = array<i64: 1, 128>}, {pipeline_mode = #tpu.pipeline_mode<synchronous>, transform_indices = @transform_3, window_bounds = array<i64: 128, 128>}, {pipeline_mode = #tpu.pipeline_mode<synchronous>, transform_indices = @transform_4, window_bounds = array<i64: 1, 128>}, {pipeline_mode = #tpu.pipeline_mode<synchronous>, transform_indices = @transform_5, window_bounds = array<i64: 128, 128>}, {pipeline_mode = #tpu.pipeline_mode<synchronous>, transform_indices = @transform_6, window_bounds = array<i64: 1, 128>}, {transform_indices = @transform_7, window_bounds = array<i64: 16, 128>}]} {
    %c0 = arith.constant 0 : index
    %c0_0 = arith.constant 0 : index
    %0 = vector.load %arg1[%c0, %c0_0] : memref<16x1024xbf16, #tpu.memory_space<vmem>>, vector<16x1024xbf16>
    %c0_1 = arith.constant 0 : index
    %c0_2 = arith.constant 0 : index
    %1 = vector.load %arg2[%c0_1, %c0_2] : memref<1024x128xbf16, #tpu.memory_space<vmem>>, vector<1024x128xbf16>
    %cst = arith.constant dense<0.000000e+00> : vector<16x128xf32>
    %2 = tpu.matmul %0, %1, %cst {dimension_numbers = #tpu.dot_dimension_numbers<[1], [0], [0], [1], [0, 0, 1, 1], [], []>} : vector<16x1024xbf16>, vector<1024x128xbf16>, vector<16x128xf32> -> vector<16x128xf32>
    %c0_3 = arith.constant 0 : index
    %c0_4 = arith.constant 0 : index
    %3 = vector.load %arg3[%c0_3, %c0_4] : memref<1x128xf32, #tpu.memory_space<vmem>>, vector<1x128xf32>
    %4 = vector.broadcast %3 : vector<1x128xf32> to vector<16x128xf32>
    %5 = arith.addf %2, %4 : vector<16x128xf32>
    %cst_5 = arith.constant 0.000000e+00 : f32
    %6 = vector.broadcast %cst_5 : f32 to vector<16x128xf32>
    %7 = arith.maximumf %5, %6 : vector<16x128xf32>
    %8 = arith.truncf %7 : vector<16x128xf32> to vector<16x128xbf16>
    %c0_6 = arith.constant 0 : index
    %c0_7 = arith.constant 0 : index
    %9 = vector.load %arg4[%c0_6, %c0_7] : memref<128x128xbf16, #tpu.memory_space<vmem>>, vector<128x128xbf16>
    %cst_8 = arith.constant dense<0.000000e+00> : vector<16x128xf32>
    %10 = tpu.matmul %8, %9, %cst_8 {dimension_numbers = #tpu.dot_dimension_numbers<[1], [0], [0], [1], [0, 0, 1, 1], [], []>} : vector<16x128xbf16>, vector<128x128xbf16>, vector<16x128xf32> -> vector<16x128xf32>
    %c0_9 = arith.constant 0 : index
    %c0_10 = arith.constant 0 : index
    %11 = vector.load %arg5[%c0_9, %c0_10] : memref<1x128xf32, #tpu.memory_space<vmem>>, vector<1x128xf32>
    %12 = vector.broadcast %11 : vector<1x128xf32> to vector<16x128xf32>
    %13 = arith.addf %10, %12 : vector<16x128xf32>
    %cst_11 = arith.constant 0.000000e+00 : f32
    %14 = vector.broadcast %cst_11 : f32 to vector<16x128xf32>
    %15 = arith.maximumf %13, %14 : vector<16x128xf32>
    %16 = arith.truncf %15 : vector<16x128xf32> to vector<16x128xbf16>
    %c0_12 = arith.constant 0 : index
    %c0_13 = arith.constant 0 : index
    %17 = vector.load %arg6[%c0_12, %c0_13] : memref<128x128xbf16, #tpu.memory_space<vmem>>, vector<128x128xbf16>
    %cst_14 = arith.constant dense<0.000000e+00> : vector<16x128xf32>
    %18 = tpu.matmul %16, %17, %cst_14 {dimension_numbers = #tpu.dot_dimension_numbers<[1], [0], [0], [1], [0, 0, 1, 1], [], []>} : vector<16x128xbf16>, vector<128x128xbf16>, vector<16x128xf32> -> vector<16x128xf32>
    %c0_15 = arith.constant 0 : index
    %c0_16 = arith.constant 0 : index
    %19 = vector.load %arg7[%c0_15, %c0_16] : memref<1x128xf32, #tpu.memory_space<vmem>>, vector<1x128xf32>
    %20 = vector.broadcast %19 : vector<1x128xf32> to vector<16x128xf32>
    %21 = arith.addf %18, %20 : vector<16x128xf32>
    %22 = tpu.iota {dimensions = array<i32: 1>} : vector<16x128xi32>
    %c8_i32 = arith.constant 8 : i32
    %23 = vector.broadcast %c8_i32 : i32 to vector<16x128xi32>
    %24 = arith.cmpi slt, %22, %23 : vector<16x128xi32>
    %cst_17 = arith.constant -1.000000e+30 : f32
    %25 = vector.broadcast %cst_17 : f32 to vector<16x128xf32>
    %26 = arith.select %24, %21, %25 : vector<16x128xi1>, vector<16x128xf32>
    %cst_18 = arith.constant dense<0xFF800000> : vector<16xf32>
    %27 = vector.multi_reduction <maximumf>, %26, %cst_18 [1] : vector<16x128xf32> to vector<16xf32>
    %28 = vector.shape_cast %27 : vector<16xf32> to vector<16x1xf32>
    %29 = vector.broadcast %28 : vector<16x1xf32> to vector<16x128xf32>
    %30 = arith.subf %26, %29 : vector<16x128xf32>
    %31 = math.exp %30 : vector<16x128xf32>
    %cst_19 = arith.constant dense<0.000000e+00> : vector<16xf32>
    %32 = vector.multi_reduction <add>, %31, %cst_19 [1] : vector<16x128xf32> to vector<16xf32>
    %33 = vector.shape_cast %32 : vector<16xf32> to vector<16x1xf32>
    %34 = vector.broadcast %33 : vector<16x1xf32> to vector<16x128xf32>
    %35 = arith.divf %31, %34 : vector<16x128xf32>
    %c0_20 = arith.constant 0 : index
    %c0_21 = arith.constant 0 : index
    %36 = vector.load %arg8[%c0_20, %c0_21] : memref<16x128xf32, #tpu.memory_space<vmem>>, vector<16x128xf32>
    tpu.vector_store %arg8[%c0_20, %c0_21], %35 {strides = array<i32>} : memref<16x128xf32, #tpu.memory_space<vmem>>, vector<16x128xf32>,
    return
  }
  func.func @transform_0(%arg0: i32) -> (i32, i32) {
    %c0_i32 = arith.constant 0 : i32
    %c0_i32_0 = arith.constant 0 : i32
    return %arg0, %c0_i32 : i32, i32
  }
  func.func @transform_1(%arg0: i32) -> (i32, i32) {
    %c0_i32 = arith.constant 0 : i32
    %c0_i32_0 = arith.constant 0 : i32
    %c0_i32_1 = arith.constant 0 : i32
    return %c0_i32, %c0_i32_0 : i32, i32
  }
  func.func @transform_2(%arg0: i32) -> (i32, i32) {
    %c0_i32 = arith.constant 0 : i32
    %c0_i32_0 = arith.constant 0 : i32
    %c0_i32_1 = arith.constant 0 : i32
    return %c0_i32, %c0_i32_0 : i32, i32
  }
  func.func @transform_3(%arg0: i32) -> (i32, i32) {
    %c0_i32 = arith.constant 0 : i32
    %c0_i32_0 = arith.constant 0 : i32
    %c0_i32_1 = arith.constant 0 : i32
    return %c0_i32, %c0_i32_0 : i32, i32
  }
  func.func @transform_4(%arg0: i32) -> (i32, i32) {
    %c0_i32 = arith.constant 0 : i32
    %c0_i32_0 = arith.constant 0 : i32
    %c0_i32_1 = arith.constant 0 : i32
    return %c0_i32, %c0_i32_0 : i32, i32
  }
  func.func @transform_5(%arg0: i32) -> (i32, i32) {
    %c0_i32 = arith.constant 0 : i32
    %c0_i32_0 = arith.constant 0 : i32
    %c0_i32_1 = arith.constant 0 : i32
    return %c0_i32, %c0_i32_0 : i32, i32
  }
  func.func @transform_6(%arg0: i32) -> (i32, i32) {
    %c0_i32 = arith.constant 0 : i32
    %c0_i32_0 = arith.constant 0 : i32
    %c0_i32_1 = arith.constant 0 : i32
    return %c0_i32, %c0_i32_0 : i32, i32
  }
  func.func @transform_7(%arg0: i32) -> (i32, i32) {
    %c0_i32 = arith.constant 0 : i32
    %c0_i32_0 = arith.constant 0 : i32
    return %arg0, %c0_i32 : i32, i32
  }
}

</mosaic_0001>

<bundles_post_ra>
// kernel: tpu_custom_call.1
= control target key start
LH: loop header
LB: loop body
LE: loop exit
PB: predicated region body
PF: predicated region fallthrough
CT: control target
= control target key end

     0   :  { %12 = vsyncpa [#allocation3], 0  ;;  %s1700_s0 = inlined_call_operand.hbm [shape: bf16[16,1024], index: 0, kind: input, shape index: {}]   ;;  %s1701_s1 = inlined_call_operand.hbm [shape: bf16[1024,128], index: 1, kind: input, shape index: {}]   ;;  %s1702_s2 = inlined_call_operand.vmem [shape: f32[1,128], index: 2, kind: input, shape index: {}]   ;;  %s1703_s3 = inlined_call_operand.hbm [shape: bf16[128,128], index: 3, kind: input, shape index: {}]   ;;  %s1704_s4 = inlined_call_operand.vmem [shape: f32[1,128], index: 4, kind: input, shape index: {}]   ;;  %s1705_s5 = inlined_call_operand.hbm [shape: bf16[128,128], index: 5, kind: input, shape index: {}]   ;;  %s1706_s6 = inlined_call_operand.vmem [shape: f32[1,128], index: 6, kind: input, shape index: {}]   ;;  %s1707_s7 = inlined_call_operand.hbm [shape: f32[16,128], index: 7, kind: output, shape index: {}]  }
   0x1   :  { %13 = vsyncpa [#allocation6], 0 }
   0x2   :  { %14 = vsyncpa [#allocation9], 0 }
   0x3   :  { %15 = vsyncpa [#allocation4], 0  ;;  %s1544_s24 = smov [#allocation5]   ;;  %s1426_s28 = scalar_lea.hbm %s1701_s1, 8192 }
   0x4   :  { %s33_s25 = sshll.u32 %s1544_s24, 4  ;;  %p1427_p0 = scmp.ne.s32.totalorder %s1701_s1, %s1426_s28  ;;  %s34_s25 = int_to_ptr.vmem [resolvable:$true] %s33_s25 }
   0x5   :  { %p1430_p1 = scmp.lt.u32.totalorder %s1426_s28, %s1701_s1 }
   0x7   :  { %p1432_p2 = pnand %p1430_p1, %p1427_p0 }
   0x9   :  { %1435 = shalt.err (!%p1432_p2)
}
   0xa   :  { %s1436_s10 = scalar_lea.vmem %s34_s25, 8192  ;;  %p1441_p4 = scmp.lt.s32.totalorder %s34_s25, %s34_s25 }
   0xb   :  { %p1437_p3 = scmp.ne.s32.totalorder %s34_s25, %s1436_s10  ;;  %p1442_p5 = scmp.lt.s32.totalorder %s1436_s10, %s1436_s10 }
   0xd   :  { %p1443_p6 = por %p1442_p5, %p1441_p4 }
   0xf   :  { %p1444_p7 = pnand %p1443_p6, %p1437_p3 }
  0x11   :  { %1447 = shalt.err (!%p1444_p7)
}
  0x12   :  { %s1545_s11 = smov 64   ;;  %s1546_s12 = smov 4  }
  0x13   :  { %39 = dma.hbm_to_vmem [thread:$0]  %s1701_s1, 8192, %s34_s25, [#allocation6], %s1545_s11, %s1545_s11, %s1546_s12  }
  0x14   :  { %s1547_s15 = smov [#allocation2]   ;;  %s1448_s19 = scalar_lea.hbm %s1700_s0, 1024 }
  0x15   :  { %s21_s16 = sshll.u32 %s1547_s15, 4  ;;  %p1449_p8 = scmp.ne.s32.totalorder %s1700_s0, %s1448_s19  ;;  %s22_s16 = int_to_ptr.vmem [resolvable:$true] %s21_s16 }
  0x16   :  { %p1452_p9 = scmp.lt.u32.totalorder %s1448_s19, %s1700_s0 }
  0x18   :  { %p1454_p10 = pnand %p1452_p9, %p1449_p8 }
  0x1a   :  { %1457 = shalt.err (!%p1454_p10)
}
  0x1b   :  { %s1458_s24 = scalar_lea.vmem %s22_s16, 1024  ;;  %p1463_p12 = scmp.lt.s32.totalorder %s22_s16, %s22_s16 }
  0x1c   :  { %p1459_p11 = scmp.ne.s32.totalorder %s22_s16, %s1458_s24  ;;  %p1464_p13 = scmp.lt.s32.totalorder %s1458_s24, %s1458_s24 }
  0x1e   :  { %p1465_p0 = por %p1464_p13, %p1463_p12 }
  0x20   :  { %p1466_p1 = pnand %p1465_p0, %p1459_p11 }
  0x22   :  { %1469 = shalt.err (!%p1466_p1)
}
  0x23   :  { %s1548_s1 = smov 512   ;;  %s1549_s25 = smov 32  }
  0x24   :  { %27 = dma.hbm_to_vmem [thread:$0]  %s1700_s0, 1024, %s22_s16, [#allocation3], %s1548_s1, %s1548_s1, %s1549_s25  }
  0x25   :  { %s1550_s28 = smov [#allocation7]   ;;  %s1551_s30 = smov [#allocation8]  }
  0x26   :  { %s47_s29 = sshll.u32 %s1550_s28, 4  ;;  %s61_s8 = sshll.u32 %s1551_s30, 4  ;;  %s48_s29 = int_to_ptr.vmem [resolvable:$true] %s47_s29  ;;  %s1624_s8 = int_to_ptr.vmem [resolvable:$true] %s61_s8 }
  0x27   :  { %s1470_s13 = scalar_lea.hbm %s1703_s3, 1024 }
  0x28   :  { %p1471_p2 = scmp.ne.s32.totalorder %s1703_s3, %s1470_s13  ;;  %p1474_p3 = scmp.lt.u32.totalorder %s1470_s13, %s1703_s3 }
  0x2a   :  { %p1476_p4 = pnand %p1474_p3, %p1471_p2 }
  0x2c   :  { %1479 = shalt.err (!%p1476_p4)
}
  0x2d   :  { %s1480_s0 = scalar_lea.vmem %s48_s29, 1024  ;;  %p1485_p6 = scmp.lt.s32.totalorder %s48_s29, %s48_s29 }
  0x2e   :  { %p1481_p5 = scmp.ne.s32.totalorder %s48_s29, %s1480_s0  ;;  %p1486_p7 = scmp.lt.s32.totalorder %s1480_s0, %s1480_s0 }
  0x30   :  { %p1487_p8 = por %p1486_p7, %p1485_p6 }
  0x32   :  { %p1488_p9 = pnand %p1487_p8, %p1481_p5 }
  0x34   :  { %1491 = shalt.err (!%p1488_p9)
}
  0x35   :  { %53 = dma.hbm_to_vmem [thread:$0]  %s1703_s3, 1024, %s48_s29, [#allocation6], %s1545_s11, %s1545_s11, %s1546_s12  }
  0x36   :  { %s1492_s22 = scalar_lea.hbm %s1705_s5, 1024 }
  0x37   :  { %p1493_p10 = scmp.ne.s32.totalorder %s1705_s5, %s1492_s22  ;;  %p1496_p11 = scmp.lt.u32.totalorder %s1492_s22, %s1705_s5 }
  0x39   :  { %p1498_p12 = pnand %p1496_p11, %p1493_p10 }
  0x3b   :  { %1501 = shalt.err (!%p1498_p12)
}
  0x3c   :  { %s1502_s26 = scalar_lea.vmem %s1624_s8, 1024  ;;  %p1507_p0 = scmp.lt.s32.totalorder %s1624_s8, %s1624_s8 }
  0x3d   :  { %p1503_p13 = scmp.ne.s32.totalorder %s1624_s8, %s1502_s26  ;;  %p1508_p1 = scmp.lt.s32.totalorder %s1502_s26, %s1502_s26 }
  0x3f   :  { %p1509_p2 = por %p1508_p1, %p1507_p0 }
  0x41   :  { %p1510_p3 = pnand %p1509_p2, %p1503_p13 }
  0x43   :  { %1513 = shalt.err (!%p1510_p3)
}
  0x44   :  { %67 = dma.hbm_to_vmem [thread:$0]  %s1705_s5, 1024, %s1624_s8, [#allocation9], %s1545_s11, %s1545_s11, %s1546_s12  }
  0x45   :  { %1536 = dma.done.wait [#allocation3], 1024  }
  0x46   :  { %1537 = vsyncadd [#allocation3], 4294966272 }
  0x47   :  { %1538 = dma.done.wait [#allocation6], 9216  }
  0x48   :  { %1539 = vsyncadd [#allocation6], 4294958080 }
  0x49   :  { %1540 = dma.done.wait [#allocation9], 1024  }
  0x4a   :  { %1541 = vsyncadd [#allocation9], 4294966272  ;;  %v1338_v0 = vld [vmem:[#allocation5 + $0x40] sm:$0xff]   ;;  %v1342_v4 = vld [vmem:[#allocation5 + $0x48] sm:$0xff]   ;;  %vm1553_vm0 = vmmov 0  }
  0x4b   :  { %v1339_v1 = vld [vmem:[#allocation5 + $0xc0] sm:$0xff]   ;;  %1179 = vmatprep.subr.bf16.mxu0 %v1338_v0  ;;  %v1343_v5 = vld [vmem:[#allocation5 + $0xc8] sm:$0xff]   ;;  %v1346_v8 = vld [vmem:[#allocation5 + $0x50] sm:$0xff]  }
  0x4c   :  { %v1340_v2 = vld [vmem:[#allocation5] sm:$0xff]   ;;  %1201 = vmatprep.subr.bf16.mxu1 %v1339_v1  ;;  %v1344_v6 = vld [vmem:[#allocation5 + $0x8] sm:$0xff]   ;;  %v1347_v9 = vld [vmem:[#allocation5 + $0xd0] sm:$0xff]  }
  0x4d   :  { %v1341_v3 = vld [vmem:[#allocation5 + $0x80] sm:$0xff]   ;;  %1180 = vmatpush3.bf16.msra.mxu0 %v1340_v2  ;;  %v1345_v7 = vld [vmem:[#allocation5 + $0x88] sm:$0xff]   ;;  %v1348_v10 = vld [vmem:[#allocation5 + $0x10] sm:$0xff]  }
  0x4e   :  { %1202 = vmatpush3.bf16.msra.mxu1 %v1341_v3  ;;  %1181 = vmatprep.subr.bf16.mxu0 %v1342_v4  ;;  %v1349_v11 = vld [vmem:[#allocation5 + $0x90] sm:$0xff]   ;;  %v1350_v12 = vld [vmem:[#allocation5 + $0x58] sm:$0xff]   ;;  %v1354_v16 = vld [vmem:[#allocation5 + $0x60] sm:$0xff]  }
  0x4f   :  { %1203 = vmatprep.subr.bf16.mxu1 %v1343_v5  ;;  %v1351_v13 = vld [vmem:[#allocation5 + $0xd8] sm:$0xff]   ;;  %v1355_v17 = vld [vmem:[#allocation5 + $0xe0] sm:$0xff]   ;;  %v1358_v20 = vld [vmem:[#allocation5 + $0x68] sm:$0xff]  }
  0x50   :  { %v1352_v14 = vld [vmem:[#allocation5 + $0x18] sm:$0xff]   ;;  %v1356_v18 = vld [vmem:[#allocation5 + $0x20] sm:$0xff]   ;;  %v1359_v21 = vld [vmem:[#allocation5 + $0xe8] sm:$0xff]  }
  0x51   :  { %1182 = vmatpush3.bf16.msra.mxu0 %v1344_v6  ;;  %v1353_v15 = vld [vmem:[#allocation5 + $0x98] sm:$0xff]   ;;  %v1357_v19 = vld [vmem:[#allocation5 + $0xa0] sm:$0xff]   ;;  %v1360_v22 = vld [vmem:[#allocation5 + $0x28] sm:$0xff]  }
  0x52   :  { %1204 = vmatpush3.bf16.msra.mxu1 %v1345_v7  ;;  %1183 = vmatprep.subr.bf16.mxu0 %v1346_v8  ;;  %v1361_v23 = vld [vmem:[#allocation5 + $0xa8] sm:$0xff]   ;;  %v1362_v24 = vld [vmem:[#allocation5 + $0x70] sm:$0xff]   ;;  %v1366_v28 = vld [vmem:[#allocation5 + $0x78] sm:$0xff]  }
  0x53   :  { %1205 = vmatprep.subr.bf16.mxu1 %v1347_v9  ;;  %v1363_v25 = vld [vmem:[#allocation5 + $0xf0] sm:$0xff]   ;;  %v1367_v29 = vld [vmem:[#allocation5 + $0xf8] sm:$0xff]   ;;  %v83_v32 = vld [vmem:[#allocation2] sm:$0xff] }
  0x54   :  { %v1364_v26 = vld [vmem:[#allocation5 + $0x30] sm:$0xff]   ;;  %v1368_v30 = vld [vmem:[#allocation5 + $0x38] sm:$0xff]   ;;  %v87_v33 = vld [vmem:[#allocation2 + $0x20] sm:$0xff] }
  0x55   :  { %1184 = vmatpush3.bf16.msra.mxu0 %v1348_v10  ;;  %v1365_v27 = vld [vmem:[#allocation5 + $0xb0] sm:$0xff]   ;;  %v1369_v31 = vld [vmem:[#allocation5 + $0xb8] sm:$0xff]   ;;  %v84_v34 = vld [vmem:[#allocation2 + $0x8] sm:$0xff]  ;;  %v1089_v35 = vcombine.low %v83_v32, %v87_v33  ;;  %v1090_v36 = vcombine.high %v83_v32, %v87_v33 }
  0x56   :  { %1206 = vmatpush3.bf16.msra.mxu1 %v1349_v11  ;;  %1185 = vmatprep.subr.bf16.mxu0 %v1350_v12  ;;  %v88_v37 = vld [vmem:[#allocation2 + $0x28] sm:$0xff]  ;;  %v1370_v40 = vld [vmem:[#allocation5 + $0x140] sm:$0xff]   ;;  %v1378_v48 = vld [vmem:[#allocation5 + $0x150] sm:$0xff]  }
  0x57   :  { %1207 = vmatprep.subr.bf16.mxu1 %v1351_v13  ;;  %v1091_v38 = vcombine.low %v84_v34, %v88_v37  ;;  %v1092_v39 = vcombine.high %v84_v34, %v88_v37  ;;  %682 = vmatprep.mubr.bf16.mxu0 %v1090_v36  ;;  %v1371_v41 = vld [vmem:[#allocation5 + $0x1c0] sm:$0xff]   ;;  %v1374_v44 = vld [vmem:[#allocation5 + $0x148] sm:$0xff]   ;;  %v1379_v49 = vld [vmem:[#allocation5 + $0x1d0] sm:$0xff]  }
  0x58   :  { %v1372_v42 = vld [vmem:[#allocation5 + $0x100] sm:$0xff]   ;;  %v1375_v45 = vld [vmem:[#allocation5 + $0x1c8] sm:$0xff]   ;;  %v1380_v50 = vld [vmem:[#allocation5 + $0x110] sm:$0xff]  }
  0x59   :  { %1186 = vmatpush3.bf16.msra.mxu0 %v1352_v14  ;;  %723 = vmatprep.mubr.bf16.mxu1 %v1092_v39  ;;  %v1373_v43 = vld [vmem:[#allocation5 + $0x180] sm:$0xff]   ;;  %v1376_v46 = vld [vmem:[#allocation5 + $0x108] sm:$0xff]   ;;  %v1381_v51 = vld [vmem:[#allocation5 + $0x190] sm:$0xff]  }
  0x5a   :  { %1208 = vmatpush3.bf16.msra.mxu1 %v1353_v15  ;;  %1187 = vmatprep.subr.bf16.mxu0 %v1354_v16  ;;  %v1377_v47 = vld [vmem:[#allocation5 + $0x188] sm:$0xff]   ;;  %v1382_v52 = vld [vmem:[#allocation5 + $0x158] sm:$0xff]   ;;  %v1386_v56 = vld [vmem:[#allocation5 + $0x160] sm:$0xff]  }
  0x5b   :  { %1209 = vmatprep.subr.bf16.mxu1 %v1355_v17  ;;  %v1383_v53 = vld [vmem:[#allocation5 + $0x1d8] sm:$0xff]   ;;  %v1387_v57 = vld [vmem:[#allocation5 + $0x1e0] sm:$0xff]   ;;  %v1390_v60 = vld [vmem:[#allocation5 + $0x168] sm:$0xff]   ;;  %v1552_v17 = vmov 0.0  }
  0x5c   :  { %v1384_v54 = vld [vmem:[#allocation5 + $0x118] sm:$0xff]   ;;  %v1388_v58 = vld [vmem:[#allocation5 + $0x120] sm:$0xff]   ;;  %v1391_v61 = vld [vmem:[#allocation5 + $0x1e8] sm:$0xff]  }
  0x5d   :  { %1188 = vmatpush3.bf16.msra.mxu0 %v1356_v18  ;;  %v1385_v55 = vld [vmem:[#allocation5 + $0x198] sm:$0xff]   ;;  %v1389_v59 = vld [vmem:[#allocation5 + $0x1a0] sm:$0xff]   ;;  %v1392_v62 = vld [vmem:[#allocation5 + $0x128] sm:$0xff]  }
  0x5e   :  { %1210 = vmatpush3.bf16.msra.mxu1 %v1357_v19  ;;  %1189 = vmatprep.subr.bf16.mxu0 %v1358_v20  ;;  %v1393_v63 = vld [vmem:[#allocation5 + $0x1a8] sm:$0xff]   ;;  %v1394_v0 = vld [vmem:[#allocation5 + $0x170] sm:$0xff]   ;;  %v1398_v4 = vld [vmem:[#allocation5 + $0x178] sm:$0xff]  }
  0x5f   :  { %1211 = vmatprep.subr.bf16.mxu1 %v1359_v21  ;;  %v1395_v1 = vld [vmem:[#allocation5 + $0x1f0] sm:$0xff]   ;;  %v1399_v5 = vld [vmem:[#allocation5 + $0x1f8] sm:$0xff]   ;;  %v1402_v16 = vld [vmem:[#allocation7] sm:$0xff]  }
  0x60   :  { %v1396_v2 = vld [vmem:[#allocation5 + $0x130] sm:$0xff]   ;;  %v1400_v6 = vld [vmem:[#allocation5 + $0x138] sm:$0xff]   ;;  %v1403_v18 = vld [vmem:[#allocation7 + $0x8] sm:$0xff]  }
  0x61   :  { %1190 = vmatpush3.bf16.msra.mxu0 %v1360_v22  ;;  %v1397_v3 = vld [vmem:[#allocation5 + $0x1b0] sm:$0xff]   ;;  %v1401_v7 = vld [vmem:[#allocation5 + $0x1b8] sm:$0xff]   ;;  %v1406_v21 = vld [vmem:[#allocation7 + $0x20] sm:$0xff]  }
  0x62   :  { %1212 = vmatpush3.bf16.msra.mxu1 %v1361_v23  ;;  %1191 = vmatprep.subr.bf16.mxu0 %v1362_v24  ;;  %v85_v8 = vld [vmem:[#allocation2 + $0x10] sm:$0xff]  ;;  %v86_v12 = vld [vmem:[#allocation2 + $0x18] sm:$0xff]  ;;  %v1407_v22 = vld [vmem:[#allocation7 + $0x28] sm:$0xff]  }
  0x63   :  { %1213 = vmatprep.subr.bf16.mxu1 %v1363_v25  ;;  %v89_v9 = vld [vmem:[#allocation2 + $0x30] sm:$0xff]  ;;  %v90_v13 = vld [vmem:[#allocation2 + $0x38] sm:$0xff]  ;;  %v1410_v25 = vld [vmem:[#allocation8] sm:$0xff]  }
  0x64   :  { %v1093_v10 = vcombine.low %v85_v8, %v89_v9  ;;  %v1094_v11 = vcombine.high %v85_v8, %v89_v9  ;;  %v1095_v14 = vcombine.low %v86_v12, %v90_v13  ;;  %v1096_v15 = vcombine.high %v86_v12, %v90_v13  ;;  %v1404_v19 = vld [vmem:[#allocation7 + $0x10] sm:$0xff]   ;;  %v1405_v20 = vld [vmem:[#allocation7 + $0x18] sm:$0xff]   ;;  %v1088_v33 = vld [vmem:[%s1702_s2] ss:$0 sm:$0xff] }
  0x65   :  { %1192 = vmatpush3.bf16.msra.mxu0 %v1364_v26  ;;  %v1408_v23 = vld [vmem:[#allocation7 + $0x30] sm:$0xff]   ;;  %v1409_v24 = vld [vmem:[#allocation7 + $0x38] sm:$0xff]   ;;  %v1411_v26 = vld [vmem:[#allocation8 + $0x8] sm:$0xff]  }
  0x66   :  { %1214 = vmatpush3.bf16.msra.mxu1 %v1365_v27  ;;  %1193 = vmatprep.subr.bf16.mxu0 %v1366_v28  ;;  %v1412_v27 = vld [vmem:[#allocation8 + $0x10] sm:$0xff]   ;;  %v1413_v28 = vld [vmem:[#allocation8 + $0x18] sm:$0xff]  }
  0x67   :  { %1215 = vmatprep.subr.bf16.mxu1 %v1367_v29  ;;  %v1414_v29 = vld [vmem:[#allocation8 + $0x20] sm:$0xff]  }
  0x69   :  { %1194 = vmatpush3.bf16.msra.mxu0 %v1368_v30  ;;  %v1415_v30 = vld [vmem:[#allocation8 + $0x28] sm:$0xff]  }
  0x6a   :  { %1216 = vmatpush3.bf16.msra.mxu1 %v1369_v31  ;;  %1223 = vmatprep.subr.bf16.mxu0 %v1370_v40 }
  0x6b   :  { %1245 = vmatprep.subr.bf16.mxu1 %v1371_v41 }
  0x6c   :  { %683 = vmatmul.mubr.bf16.vlgmr.msra.gmra.mrb[0].mxu0 %v1089_v35 }
  0x6d   :  { %724 = vmatmul.mubr.bf16.vlgmr.msra.gmra.mrb[0].mxu1 %v1091_v38  ;;  %1224 = vmatpush3.bf16.msra.mxu0 %v1372_v42 }
  0x6e   :  { %1246 = vmatpush3.bf16.msra.mxu1 %v1373_v43  ;;  %1225 = vmatprep.subr.bf16.mxu0 %v1374_v44 }
  0x6f   :  { %1247 = vmatprep.subr.bf16.mxu1 %v1375_v45  ;;  %764 = vmatprep.mubr.bf16.mxu0 %v1094_v11 }
  0x70   :  { %805 = vmatprep.mubr.bf16.mxu1 %v1096_v15  ;;  %v1044_v15 = vlaneseq }
  0x71   :  { %1226 = vmatpush3.bf16.msra.mxu0 %v1376_v46 }
  0x72   :  { %1248 = vmatpush3.bf16.msra.mxu1 %v1377_v47  ;;  %1227 = vmatprep.subr.bf16.mxu0 %v1378_v48 }
  0x73   :  { %1249 = vmatprep.subr.bf16.mxu1 %v1379_v49 }
  0x75   :  { %1228 = vmatpush3.bf16.msra.mxu0 %v1380_v50 }
  0x76   :  { %1250 = vmatpush3.bf16.msra.mxu1 %v1381_v51  ;;  %1229 = vmatprep.subr.bf16.mxu0 %v1382_v52 }
  0x77   :  { %1251 = vmatprep.subr.bf16.mxu1 %v1383_v53 }
  0x79   :  { %1230 = vmatpush3.bf16.msra.mxu0 %v1384_v54 }
  0x7a   :  { %1252 = vmatpush3.bf16.msra.mxu1 %v1385_v55  ;;  %1231 = vmatprep.subr.bf16.mxu0 %v1386_v56 }
  0x7b   :  { %1253 = vmatprep.subr.bf16.mxu1 %v1387_v57 }
  0x7d   :  { %1232 = vmatpush3.bf16.msra.mxu0 %v1388_v58 }
  0x7e   :  { %1254 = vmatpush3.bf16.msra.mxu1 %v1389_v59  ;;  %1233 = vmatprep.subr.bf16.mxu0 %v1390_v60 }
  0x7f   :  { %1255 = vmatprep.subr.bf16.mxu1 %v1391_v61 }
  0x81   :  { %1234 = vmatpush3.bf16.msra.mxu0 %v1392_v62 }
  0x82   :  { %1256 = vmatpush3.bf16.msra.mxu1 %v1393_v63  ;;  %1235 = vmatprep.subr.bf16.mxu0 %v1394_v0 }
  0x83   :  { %1257 = vmatprep.subr.bf16.mxu1 %v1395_v1 }
  0x85   :  { %1236 = vmatpush3.bf16.msra.mxu0 %v1396_v2 }
  0x86   :  { %1258 = vmatpush3.bf16.msra.mxu1 %v1397_v3  ;;  %1237 = vmatprep.subr.bf16.mxu0 %v1398_v4  ;;  %v1416_v3 = vld [vmem:[#allocation8 + $0x30] sm:$0xff]   ;;  %v1417_v4 = vld [vmem:[#allocation8 + $0x38] sm:$0xff]  }
  0x87   :  { %1259 = vmatprep.subr.bf16.mxu1 %v1399_v5  ;;  %v1161_v5 = vld [vmem:[%s1704_s4] ss:$0 sm:$0xff]  ;;  %s1554_s4 = smov [#allocation10]  }
  0x89   :  { %1238 = vmatpush3.bf16.msra.mxu0 %v1400_v6 }
  0x8a   :  { %1260 = vmatpush3.bf16.msra.mxu1 %v1401_v7  ;;  %1285 = vmatprep.subr.bf16.mxu0 %v1552_v17 }
  0x8b   :  { %1305 = vmatprep.subr.bf16.mxu1 %v1552_v17 }
  0x8c   :  { %765 = vmatmul.mubr.bf16.vlgmr.msra.gmra.mrb[4].mxu0 %v1093_v10 }
  0x8d   :  { %806 = vmatmul.mubr.bf16.vlgmr.msra.gmra.mrb[4].mxu1 %v1095_v14  ;;  %1286 = vmatpush3.bf16.msra.mxu0 %v1402_v16  ;;  %v1045_v16 = vand.u32 127, %v1044_v15 }
  0x8e   :  { %1287 = vmatprep.subr.bf16.mxu0 %v1552_v17  ;;  %1301 = vmatprep.mubr.msk.bf16.mxu0 %vm1553_vm0, %v1552_v17 }
  0x8f   :  { %1321 = vmatprep.mubr.msk.bf16.mxu1 %vm1553_vm0, %v1552_v17  ;;  %1306 = vmatpush3.bf16.msra.mxu1 %v1410_v25  ;;  %vm1046_vm1 = vcmp.lt.s32.totalorder %v1045_v16, 8 }
  0x90   :  { %1307 = vmatprep.subr.bf16.mxu1 %v1552_v17 }
  0x91   :  { %1288 = vmatpush3.bf16.msra.mxu0 %v1403_v18 }
  0x92   :  { %1289 = vmatprep.subr.bf16.mxu0 %v1552_v17 }
  0x93   :  { %1308 = vmatpush3.bf16.msra.mxu1 %v1411_v26 }
  0x94   :  { %1309 = vmatprep.subr.bf16.mxu1 %v1552_v17 }
  0x95   :  { %1290 = vmatpush3.bf16.msra.mxu0 %v1404_v19 }
  0x96   :  { %1291 = vmatprep.subr.bf16.mxu0 %v1552_v17 }
  0x97   :  { %1310 = vmatpush3.bf16.msra.mxu1 %v1412_v27 }
  0x98   :  { %1311 = vmatprep.subr.bf16.mxu1 %v1552_v17 }
  0x99   :  { %1292 = vmatpush3.bf16.msra.mxu0 %v1405_v20 }
  0x9a   :  { %1293 = vmatprep.subr.bf16.mxu0 %v1552_v17 }
  0x9b   :  { %1312 = vmatpush3.bf16.msra.mxu1 %v1413_v28 }
  0x9c   :  { %1313 = vmatprep.subr.bf16.mxu1 %v1552_v17 }
  0x9d   :  { %1294 = vmatpush3.bf16.msra.mxu0 %v1406_v21 }
  0x9e   :  { %1295 = vmatprep.subr.bf16.mxu0 %v1552_v17 }
  0x9f   :  { %1314 = vmatpush3.bf16.msra.mxu1 %v1414_v29 }
  0xa0   :  { %1315 = vmatprep.subr.bf16.mxu1 %v1552_v17 }
  0xa1   :  { %1296 = vmatpush3.bf16.msra.mxu0 %v1407_v22 }
  0xa2   :  { %1297 = vmatprep.subr.bf16.mxu0 %v1552_v17 }
  0xa3   :  { %1316 = vmatpush3.bf16.msra.mxu1 %v1415_v30 }
  0xa4   :  { %1317 = vmatprep.subr.bf16.mxu1 %v1552_v17 }
  0xa5   :  { %1298 = vmatpush3.bf16.msra.mxu0 %v1408_v23 }
  0xa6   :  { %1299 = vmatprep.subr.bf16.mxu0 %v1552_v17 }
  0xa7   :  { %1318 = vmatpush3.bf16.msra.mxu1 %v1416_v3 }
  0xa8   :  { %1319 = vmatprep.subr.bf16.mxu1 %v1552_v17  ;;  %v1170_v17 = vld [vmem:[%s1706_s6] ss:$0 sm:$0xff]  ;;  %s1074_s6 = sshll.u32 %s1554_s4, 4  ;;  %s1075_s6 = int_to_ptr.vmem [resolvable:$true] %s1074_s6 }
  0xa9   :  { %1300 = vmatpush3.bf16.msra.mxu0 %v1409_v24  ;;  %s1514_s30 = scalar_lea.vmem %s1075_s6, 256  ;;  %p1519_p5 = scmp.lt.s32.totalorder %s1075_s6, %s1075_s6 }
  0xaa   :  { %p1515_p4 = scmp.ne.s32.totalorder %s1075_s6, %s1514_s30  ;;  %p1520_p6 = scmp.lt.s32.totalorder %s1514_s30, %s1514_s30 }
  0xab   :  { %1320 = vmatpush3.bf16.msra.mxu1 %v1417_v4 }
  0xac   :  { %p1521_p7 = por %p1520_p6, %p1519_p5 }
  0xae   :  { %p1522_p8 = pnand %p1521_p7, %p1515_p4 }
 0x13f   :  { %v1195_v31 = vpop.f32.mrb[0].mxu0 }
 0x140   :  { %v1217_v32 = vpop.f32.mrb[0].mxu1  ;;  %v1196_v34 = vpop.f32.mrb[1].mxu0 }
 0x141   :  { %v1197_v35 = vadd.f32 %v1196_v34, %v1195_v31  ;;  %v1218_v36 = vpop.f32.mrb[1].mxu1  ;;  %v1198_v37 = vpop.f32.mrb[2].mxu0 }
 0x142   :  { %v1219_v38 = vadd.f32 %v1218_v36, %v1217_v32  ;;  %v1220_v39 = vpop.f32.mrb[2].mxu1  ;;  %v1199_v40 = vpop.f32.mrb[3].mxu0 }
 0x143   :  { %v685_v41 = vadd.f32 %v1197_v35, %v1088_v33  ;;  %v1200_v42 = vadd.f32 %v1199_v40, %v1198_v37  ;;  %v1221_v43 = vpop.f32.mrb[3].mxu1 }
 0x144   :  { %v1222_v44 = vadd.f32 %v1221_v43, %v1220_v39 }
 0x145   :  { %v726_v45 = vadd.f32 %v1219_v38, %v685_v41  ;;  %v688_v46 = vadd.f32 %v1200_v42, %v1088_v33 }
 0x147   :  { %v729_v47 = vadd.f32 %v1222_v44, %v688_v46 }
 0x15f   :  { %v1239_v48 = vpop.f32.mrb[4].mxu0 }
 0x160   :  { %v1261_v49 = vpop.f32.mrb[4].mxu1  ;;  %v1240_v50 = vpop.f32.mrb[5].mxu0 }
 0x161   :  { %v1241_v51 = vadd.f32 %v1240_v50, %v1239_v48  ;;  %v1262_v52 = vpop.f32.mrb[5].mxu1  ;;  %v1242_v53 = vpop.f32.mrb[6].mxu0 }
 0x162   :  { %v1263_v54 = vadd.f32 %v1262_v52, %v1261_v49  ;;  %v1264_v55 = vpop.f32.mrb[6].mxu1  ;;  %v1243_v56 = vpop.f32.mrb[7].mxu0 }
 0x163   :  { %v767_v57 = vadd.f32 %v1241_v51, %v726_v45  ;;  %v1244_v58 = vadd.f32 %v1243_v56, %v1242_v53  ;;  %v1265_v59 = vpop.f32.mrb[7].mxu1 }
 0x164   :  { %v1266_v60 = vadd.f32 %v1265_v59, %v1264_v55 }
 0x165   :  { %v808_v61 = vadd.f32 %v1263_v54, %v767_v57  ;;  %v770_v62 = vadd.f32 %v1244_v58, %v729_v47 }
 0x167   :  { %v811_v63 = vadd.f32 %v1266_v60, %v770_v62  ;;  %v814_v0 = vmax.f32 %v808_v61, 0.0 }
 0x169   :  { %v815_v1 = vmax.f32 %v811_v63, 0.0 }
 0x16b   :  { %v816_v2 = vpack.c.bf16 %v815_v1, %v814_v0 }
 0x16d   :  { %1302 = vmatmul.mubr.bf16.vlgmr.msra.gmra.mrb[8].mxu0 %v816_v2 }
 0x240   :  { %v922_v6 = vpop.f32.mrb[8].mxu0 }
 0x241   :  { %v923_v7 = vadd.f32 %v1161_v5, %v922_v6  ;;  %v1303_v8 = vpop.f32.mrb[9].mxu0 }
 0x242   :  { %v925_v9 = vpop.f32.mrb[10].mxu0 }
 0x243   :  { %v926_v10 = vadd.f32 %v1161_v5, %v925_v9  ;;  %v1304_v11 = vpop.f32.mrb[11].mxu0  ;;  %v929_v12 = vmax.f32 %v923_v7, 0.0 }
 0x245   :  { %v930_v13 = vmax.f32 %v926_v10, 0.0 }
 0x247   :  { %v931_v14 = vpack.c.bf16 %v930_v13, %v929_v12 }
 0x249   :  { %1322 = vmatmul.mubr.bf16.vlgmr.msra.gmra.mrb[8].mxu1 %v931_v14 }
 0x31c   :  { %v1037_v18 = vpop.f32.mrb[8].mxu1 }
 0x31d   :  { %v1038_v19 = vadd.f32 %v1170_v17, %v1037_v18  ;;  %v1323_v20 = vpop.f32.mrb[9].mxu1 }
 0x31e   :  { %v1040_v21 = vpop.f32.mrb[10].mxu1 }
 0x31f   :  { %v1041_v22 = vadd.f32 %v1170_v17, %v1040_v21  ;;  %v1324_v23 = vpop.f32.mrb[11].mxu1  ;;  %v1047_v24 = vsel %vm1046_vm1, %v1038_v19, -1e+30 }
 0x320   :  { %1049 = vmax.xlane.f32.xlu0 %v1047_v24 }
 0x321   :  { %v1048_v25 = vsel %vm1046_vm1, %v1041_v22, -1e+30 }
 0x324   :  { %1051 = vmax.xlane.f32.xlu0 %v1048_v25 }
 0x3ad   :  { %v1050_v26 = vpop.xlane.xlu0 %1049 }
 0x3ae   :  { %v1053_v27 = vsub.f32 %v1047_v24, %v1050_v26 }
 0x3b0   :  { %v1055_v28 = vmul.f32 1.442695, %v1053_v27 }
 0x3b1   :  { %v1052_v29 = vpop.xlane.xlu0 %1051 }
 0x3b2   :  { %1418 = vpow2.f32 %v1055_v28  ;;  %v1054_v30 = vsub.f32 %v1048_v25, %v1052_v29 }
 0x3b4   :  { %v1057_v31 = vmul.f32 1.442695, %v1054_v30 }
 0x3b6   :  { %1420 = vpow2.f32 %v1057_v31 }
 0x3bc   :  { %v1419_v32 = vpop.eup %1418 }
 0x3bd   :  { %1059 = vadd.xlane.f32.xlu1 %v1419_v32 }
 0x3c0   :  { %v1421_v33 = vpop.eup %1420 }
 0x3c1   :  { %1061 = vadd.xlane.f32.xlu1 %v1421_v33 }
 0x44a   :  { %v1060_v34 = vpop.xlane.xlu1 %1059 }
 0x44b   :  { %1422 = vrcp.f32 %v1060_v34 }
 0x44e   :  { %v1062_v35 = vpop.xlane.xlu1 %1061 }
 0x44f   :  { %1424 = vrcp.f32 %v1062_v35 }
 0x455   :  { %v1423_v36 = vpop.eup %1422 }
 0x456   :  { %v1064_v37 = vmul.f32 %v1423_v36, %v1419_v32 }
 0x458   :  { %1067 = vst [vmem:[#allocation10] sm:$0xff] %v1064_v37 }
 0x459   :  { %v1425_v38 = vpop.eup %1424 }
 0x45a   :  { %v1066_v39 = vmul.f32 %v1425_v38, %v1421_v33 }
 0x45c   :  { %1068 = vst [vmem:[#allocation10 + $0x8] sm:$0xff] %v1066_v39 }
 0x45d   :  { %1525 = shalt.err (!%p1522_p8)
}
 0x45e   :  { %s1526_s10 = scalar_lea.hbm %s1707_s7, 256 }
 0x45f   :  { %p1527_p9 = scmp.ne.s32.totalorder %s1707_s7, %s1526_s10  ;;  %p1530_p10 = scmp.lt.u32.totalorder %s1526_s10, %s1707_s7 }
 0x461   :  { %p1532_p11 = pnand %p1530_p10, %p1527_p9 }
 0x463   :  { %1535 = shalt.err (!%p1532_p11)
}
 0x464   :  { %s1555_s18 = smov 128   ;;  %s1556_s0 = smov 8  }
 0x465   :  { %1080 = dma.vmem_to_hbm [thread:$0]  %s1075_s6, 256, %s1707_s7, [#allocation4], %s1555_s18, %s1555_s18, %s1556_s0  }
 0x466   :  { %1542 = dma.done.wait [#allocation4], 256  }
 0x467   :  { %1543 = vsyncadd [#allocation4], 4294967040 }
 0x468   :  { %1084 = vsyncpa [#allocation3], 1 }
 0x469   :  { %1085 = vsyncpa [#allocation6], 1 }
 0x46a   :  { %1086 = vsyncpa [#allocation9], 1 }
 0x46b   :  { %1087 = vsyncpa [#allocation4], 1 }

</bundles_post_ra>
